<compile_context>
chip_gen: v5e
topology: v5e:2x2
jax: 0.10.0
libtpu: 0.0.40
codegen_flags: <defaults>
</compile_context>

<pallas_src>
import functools

import jax
import jax.numpy as jnp
from jax.experimental import pallas as pl
from jax.experimental.pallas import tpu as pltpu


def _round_up(a: int, b: int) -> int:
    return pl.cdiv(a, b) * b


def _mlp_softmax_kernel(x_ref, w1_ref, w2_ref, b2_ref, w3_ref, o_ref):
    # Layout: features on sublanes, batch on lanes.
    x = x_ref[...].astype(jnp.float32)            # (2, T)
    w1 = w1_ref[...]                              # (10, 2)

    # fc1 (no bias, K=2) + ReLU — two VPU broadcast FMAs (outer products);
    # an MXU matmul with K=2 would pay full push/pop latency for ~20 MACs.
    h1 = w1[:, 0:1] * x[0:1, :] + w1[:, 1:2] * x[1:2, :]     # (10, T)
    h1 = jnp.maximum(h1, 0.0)

    # fc2 (bias) + ReLU — keep on the MXU (dominant FLOPs).
    h2 = jnp.dot(w2_ref[...], h1, preferred_element_type=jnp.float32) + b2_ref[...]
    h2 = jnp.maximum(h2, 0.0)                                 # (50, T)

    # fc3 (no bias) on the MXU.
    logits = jnp.dot(w3_ref[...], h2, preferred_element_type=jnp.float32)  # (4, T)

    # softmax over the 4 feature rows (PyTorch dim=1): explicit sublane-row
    # slices — 3 maxes / 3 adds — instead of an axis reduce; exp stays
    # 128-lane dense on the EUP.
    l0 = logits[0:1, :]
    l1 = logits[1:2, :]
    l2 = logits[2:3, :]
    l3 = logits[3:4, :]
    m = jnp.maximum(jnp.maximum(l0, l1), jnp.maximum(l2, l3))  # (1, T)
    e = jnp.exp(logits - m)                                    # (4, T)
    s = e[0:1, :] + e[1:2, :] + e[2:3, :] + e[3:4, :]          # (1, T)
    # exact reciprocal keeps the 1e-5 tolerance; approx=True (EUP vrcp) would
    # introduce ~2^-12 relative error.
    probs = e * pl.reciprocal(s, approx=False)

    o_ref[...] = probs.astype(o_ref.dtype)


def prepare_params(w1, w2, b2, w3):
    """Cache kernel-layout parameters ONCE (at init / after optimizer.step).

    With the feature-major kernel layout (h = W @ x), the PyTorch (out, in)
    weight layout is already what the MXU wants — no transposes at all.

    Args (PyTorch Linear layout):
      w1: (10, 2), w2: (50, 10), b2: (50,), w3: (4, 50)
    """
    return (
        jnp.asarray(w1, dtype=jnp.float32),                  # (10, 2)
        jnp.asarray(w2, dtype=jnp.float32),                  # (50, 10)
        jnp.asarray(b2, dtype=jnp.float32).reshape(-1, 1),   # (50, 1) — lanes broadcast
        jnp.asarray(w3, dtype=jnp.float32),                  # (4, 50)
    )


@functools.partial(jax.jit, static_argnames=("tile_n",))
def low_prec_decentralized_forward(x, params, *, tile_n=2048):
    """Forward pass of the wrapped Net.

    Args:
      x:      (N, 2) float32
      params: output of prepare_params(w1, w2, b2, w3)
    Returns:
      (N, 4) float32 softmax probabilities (matches PyTorch Net.forward).
    """
    w1, w2, b2, w3 = params
    n, in_f = x.shape
    out_f = w3.shape[0]

    # Batch lives on the lane axis: pad only up to a multiple of 128 lanes.
    n128 = _round_up(n, 128)
    t = min(tile_n, n128)
    # Keep >= 2 grid steps when there is enough work, so the "parallel" batch
    # axis can shard across both TensorCores on v7x.
    if n128 // t < 2 and n128 >= 256:
        t = _round_up(pl.cdiv(n128, 2), 128)
    n_pad = _round_up(n128, t)
    grid = n_pad // t

    # One wrapper-side transpose (+ zero pad, fused by XLA) to the lane-dense
    # (features, batch) layout.  Zero-padded columns give a uniform softmax
    # and are sliced off below.
    x_t = jnp.pad(x, ((0, n_pad - n), (0, 0))).T              # (in_f, n_pad)

    out_t = pl.pallas_call(
        _mlp_softmax_kernel,
        out_shape=jax.ShapeDtypeStruct((out_f, n_pad), jnp.float32),
        grid=(grid,),
        in_specs=[
            # batch-tiled activations: lane-dense, pipelined per grid step
            pl.BlockSpec((in_f, t), lambda i: (0, i)),
            # tiny weights / bias: constant index_map -> fetched once, VMEM-resident
            pl.BlockSpec(w1.shape, lambda i: (0, 0)),
            pl.BlockSpec(w2.shape, lambda i: (0, 0)),
            pl.BlockSpec(b2.shape, lambda i: (0, 0)),
            pl.BlockSpec(w3.shape, lambda i: (0, 0)),
        ],
        out_specs=pl.BlockSpec((out_f, t), lambda i: (0, i)),
        compiler_params=pltpu.CompilerParams(
            dimension_semantics=("parallel",),   # shard batch tiles across TCs on v7x
        ),
    )(x_t, w1, w2, b2, w3)

    # Back to PyTorch's (N, 4) layout; drop padded columns.
    return out_t[:, :n].T


def _reference_forward(x, w1, w2, b2, w3):
    h1 = jnp.maximum(x @ w1.T, 0.0)
    h2 = jnp.maximum(h1 @ w2.T + b2, 0.0)
    logits = h2 @ w3.T
    return jax.nn.softmax(logits, axis=1)


if __name__ == "__main__":
    key = jax.random.PRNGKey(0)
    kx, k1, k2, kb, k3 = jax.random.split(key, 5)

    batch = 8
    # Deterministic synthetic parameters (shapes from Net.__init__).
    x = jax.random.normal(kx, (batch, 2), dtype=jnp.float32)
    w1 = jax.random.uniform(k1, (10, 2), minval=-0.5, maxval=0.5, dtype=jnp.float32)
    w2 = jax.random.uniform(k2, (50, 10), minval=-0.3, maxval=0.3, dtype=jnp.float32)
    b2 = jax.random.uniform(kb, (50,), minval=-0.3, maxval=0.3, dtype=jnp.float32)
    w3 = jax.random.uniform(k3, (4, 50), minval=-0.14, maxval=0.14, dtype=jnp.float32)

    # Cached once, outside the per-forward hot path.
    params = prepare_params(w1, w2, b2, w3)

    out = low_prec_decentralized_forward(x, params)
    out = jax.block_until_ready(out)

    ref = _reference_forward(x, w1, w2, b2, w3)
    assert out.shape == (batch, 4)
    assert jnp.allclose(out, ref, atol=1e-5, rtol=1e-5), "mismatch vs reference"
    assert jnp.allclose(jnp.sum(out, axis=1), 1.0, atol=1e-5), "softmax rows must sum to 1"

    # TODO(synk): the distributed pieces (param broadcast in __init__, ring
    # isend/irecv peer exchange, MinMaxUInt8 compress/decompress in step()) are
    # multi-process collectives with no single-device Pallas equivalent;
    # forward() does not depend on them.
    print("KERNEL_OK")
</pallas_src>

<mosaic_0001>
module attributes {stable_mosaic.version = 11 : i64} {
  func.func @_mlp_softmax_kernel(%arg0: i32, %arg1: memref<2x128xf32, #tpu.memory_space<vmem>>, %arg2: memref<10x2xf32, #tpu.memory_space<vmem>>, %arg3: memref<50x10xf32, #tpu.memory_space<vmem>>, %arg4: memref<50x1xf32, #tpu.memory_space<vmem>>, %arg5: memref<4x50xf32, #tpu.memory_space<vmem>>, %arg6: memref<4x128xf32, #tpu.memory_space<vmem>>) attributes {dimension_semantics = [#tpu.dimension_semantics<parallel>], iteration_bounds = array<i64: 1>, scalar_prefetch = 0 : i64, scratch_operands = 0 : i64, tpu.core_type = #tpu.core_type<tc>, window_params = [{transform_indices = @transform_0, window_bounds = array<i64: 2, 128>}, {pipeline_mode = #tpu.pipeline_mode<synchronous>, transform_indices = @transform_1, window_bounds = array<i64: 10, 2>}, {pipeline_mode = #tpu.pipeline_mode<synchronous>, transform_indices = @transform_2, window_bounds = array<i64: 50, 10>}, {pipeline_mode = #tpu.pipeline_mode<synchronous>, transform_indices = @transform_3, window_bounds = array<i64: 50, 1>}, {pipeline_mode = #tpu.pipeline_mode<synchronous>, transform_indices = @transform_4, window_bounds = array<i64: 4, 50>}, {transform_indices = @transform_5, window_bounds = array<i64: 4, 128>}]} {
    %c0 = arith.constant 0 : index
    %c0_0 = arith.constant 0 : index
    %0 = vector.load %arg1[%c0, %c0_0] : memref<2x128xf32, #tpu.memory_space<vmem>>, vector<2x128xf32>
    %c0_1 = arith.constant 0 : index
    %c0_2 = arith.constant 0 : index
    %1 = vector.load %arg2[%c0_1, %c0_2] : memref<10x2xf32, #tpu.memory_space<vmem>>, vector<10x2xf32>
    %2 = vector.extract_strided_slice %1 {offsets = [0, 0], sizes = [10, 1], strides = [1, 1]} : vector<10x2xf32> to vector<10x1xf32>
    %3 = vector.extract_strided_slice %0 {offsets = [0, 0], sizes = [1, 128], strides = [1, 1]} : vector<2x128xf32> to vector<1x128xf32>
    %4 = vector.broadcast %2 : vector<10x1xf32> to vector<10x128xf32>
    %5 = vector.broadcast %3 : vector<1x128xf32> to vector<10x128xf32>
    %6 = arith.mulf %4, %5 : vector<10x128xf32>
    %7 = vector.extract_strided_slice %1 {offsets = [0, 1], sizes = [10, 1], strides = [1, 1]} : vector<10x2xf32> to vector<10x1xf32>
    %8 = vector.extract_strided_slice %0 {offsets = [1, 0], sizes = [1, 128], strides = [1, 1]} : vector<2x128xf32> to vector<1x128xf32>
    %9 = vector.broadcast %7 : vector<10x1xf32> to vector<10x128xf32>
    %10 = vector.broadcast %8 : vector<1x128xf32> to vector<10x128xf32>
    %11 = arith.mulf %9, %10 : vector<10x128xf32>
    %12 = arith.addf %6, %11 : vector<10x128xf32>
    %cst = arith.constant 0.000000e+00 : f32
    %13 = vector.broadcast %cst : f32 to vector<10x128xf32>
    %14 = arith.maximumf %12, %13 : vector<10x128xf32>
    %c0_3 = arith.constant 0 : index
    %c0_4 = arith.constant 0 : index
    %15 = vector.load %arg3[%c0_3, %c0_4] : memref<50x10xf32, #tpu.memory_space<vmem>>, vector<50x10xf32>
    %cst_5 = arith.constant dense<0.000000e+00> : vector<50x128xf32>
    %16 = tpu.matmul %15, %14, %cst_5 {dimension_numbers = #tpu.dot_dimension_numbers<[1], [0], [0], [1], [0, 0, 1, 1], [], []>} : vector<50x10xf32>, vector<10x128xf32>, vector<50x128xf32> -> vector<50x128xf32>
    %c0_6 = arith.constant 0 : index
    %c0_7 = arith.constant 0 : index
    %17 = vector.load %arg4[%c0_6, %c0_7] : memref<50x1xf32, #tpu.memory_space<vmem>>, vector<50x1xf32>
    %18 = vector.broadcast %17 : vector<50x1xf32> to vector<50x128xf32>
    %19 = arith.addf %16, %18 : vector<50x128xf32>
    %cst_8 = arith.constant 0.000000e+00 : f32
    %20 = vector.broadcast %cst_8 : f32 to vector<50x128xf32>
    %21 = arith.maximumf %19, %20 : vector<50x128xf32>
    %c0_9 = arith.constant 0 : index
    %c0_10 = arith.constant 0 : index
    %22 = vector.load %arg5[%c0_9, %c0_10] : memref<4x50xf32, #tpu.memory_space<vmem>>, vector<4x50xf32>
    %cst_11 = arith.constant dense<0.000000e+00> : vector<4x128xf32>
    %23 = tpu.matmul %22, %21, %cst_11 {dimension_numbers = #tpu.dot_dimension_numbers<[1], [0], [0], [1], [0, 0, 1, 1], [], []>} : vector<4x50xf32>, vector<50x128xf32>, vector<4x128xf32> -> vector<4x128xf32>
    %24 = vector.extract_strided_slice %23 {offsets = [0, 0], sizes = [1, 128], strides = [1, 1]} : vector<4x128xf32> to vector<1x128xf32>
    %25 = vector.extract_strided_slice %23 {offsets = [1, 0], sizes = [1, 128], strides = [1, 1]} : vector<4x128xf32> to vector<1x128xf32>
    %26 = vector.extract_strided_slice %23 {offsets = [2, 0], sizes = [1, 128], strides = [1, 1]} : vector<4x128xf32> to vector<1x128xf32>
    %27 = vector.extract_strided_slice %23 {offsets = [3, 0], sizes = [1, 128], strides = [1, 1]} : vector<4x128xf32> to vector<1x128xf32>
    %28 = arith.maximumf %24, %25 : vector<1x128xf32>
    %29 = arith.maximumf %26, %27 : vector<1x128xf32>
    %30 = arith.maximumf %28, %29 : vector<1x128xf32>
    %31 = vector.broadcast %30 : vector<1x128xf32> to vector<4x128xf32>
    %32 = arith.subf %23, %31 : vector<4x128xf32>
    %33 = math.exp %32 : vector<4x128xf32>
    %34 = vector.extract_strided_slice %33 {offsets = [0, 0], sizes = [1, 128], strides = [1, 1]} : vector<4x128xf32> to vector<1x128xf32>
    %35 = vector.extract_strided_slice %33 {offsets = [1, 0], sizes = [1, 128], strides = [1, 1]} : vector<4x128xf32> to vector<1x128xf32>
    %36 = arith.addf %34, %35 : vector<1x128xf32>
    %37 = vector.extract_strided_slice %33 {offsets = [2, 0], sizes = [1, 128], strides = [1, 1]} : vector<4x128xf32> to vector<1x128xf32>
    %38 = arith.addf %36, %37 : vector<1x128xf32>
    %39 = vector.extract_strided_slice %33 {offsets = [3, 0], sizes = [1, 128], strides = [1, 1]} : vector<4x128xf32> to vector<1x128xf32>
    %40 = arith.addf %38, %39 : vector<1x128xf32>
    %41 = tpu.reciprocal %40 : vector<1x128xf32> -> vector<1x128xf32>
    %42 = vector.broadcast %41 : vector<1x128xf32> to vector<4x128xf32>
    %43 = arith.mulf %33, %42 : vector<4x128xf32>
    %c0_12 = arith.constant 0 : index
    %c0_13 = arith.constant 0 : index
    %44 = vector.load %arg6[%c0_12, %c0_13] : memref<4x128xf32, #tpu.memory_space<vmem>>, vector<4x128xf32>
    tpu.vector_store %arg6[%c0_12, %c0_13], %43 {strides = array<i32>} : memref<4x128xf32, #tpu.memory_space<vmem>>, vector<4x128xf32>,
    return
  }
  func.func @transform_0(%arg0: i32) -> (i32, i32) {
    %c0_i32 = arith.constant 0 : i32
    %c0_i32_0 = arith.constant 0 : i32
    return %c0_i32, %arg0 : i32, i32
  }
  func.func @transform_1(%arg0: i32) -> (i32, i32) {
    %c0_i32 = arith.constant 0 : i32
    %c0_i32_0 = arith.constant 0 : i32
    %c0_i32_1 = arith.constant 0 : i32
    return %c0_i32, %c0_i32_0 : i32, i32
  }
  func.func @transform_2(%arg0: i32) -> (i32, i32) {
    %c0_i32 = arith.constant 0 : i32
    %c0_i32_0 = arith.constant 0 : i32
    %c0_i32_1 = arith.constant 0 : i32
    return %c0_i32, %c0_i32_0 : i32, i32
  }
  func.func @transform_3(%arg0: i32) -> (i32, i32) {
    %c0_i32 = arith.constant 0 : i32
    %c0_i32_0 = arith.constant 0 : i32
    %c0_i32_1 = arith.constant 0 : i32
    return %c0_i32, %c0_i32_0 : i32, i32
  }
  func.func @transform_4(%arg0: i32) -> (i32, i32) {
    %c0_i32 = arith.constant 0 : i32
    %c0_i32_0 = arith.constant 0 : i32
    %c0_i32_1 = arith.constant 0 : i32
    return %c0_i32, %c0_i32_0 : i32, i32
  }
  func.func @transform_5(%arg0: i32) -> (i32, i32) {
    %c0_i32 = arith.constant 0 : i32
    %c0_i32_0 = arith.constant 0 : i32
    return %c0_i32, %arg0 : i32, i32
  }
}

</mosaic_0001>

<bundles_post_ra>
// kernel: low_prec_decentralized_forward.1
= control target key start
LH: loop header
LB: loop body
LE: loop exit
PB: predicated region body
PF: predicated region fallthrough
CT: control target
= control target key end

     0   :  { %v269_v0 = vmov 0   ;;  %v270_v3 = vmov 1   ;;  %vm122_vm0 = vcmask 1041408   ;;  %vm100_vm1 = vcmask 80896   ;;  %s369_s1 = inlined_call_operand.vmem [shape: f32[10,2], index: 1, kind: input, shape index: {}]   ;;  %s370_s0 = inlined_call_operand.vmem [shape: f32[2,128], index: 0, kind: input, shape index: {}]   ;;  %s371_s3 = inlined_call_operand.vmem [shape: f32[50,1], index: 3, kind: input, shape index: {}]   ;;  %s372_s2 = inlined_call_operand.vmem [shape: f32[50,10], index: 2, kind: input, shape index: {}]   ;;  %s373_s4 = inlined_call_operand.vmem [shape: f32[4,50], index: 4, kind: input, shape index: {}]   ;;  %s374_s5 = inlined_call_operand.vmem [shape: f32[4,128], index: 5, kind: output, shape index: {}]  }
   0x1   :  { %260 = vset.pattern.permute.xlu1 %v269_v0  ;;  %258 = vset.pattern.permute.xlu0 %v269_v0  ;;  %v22_v1 = vld [vmem:[%s369_s1 + $0x8] sm:$0x3]  ;;  %v21_v2 = vld [vmem:[%s369_s1] sm:$0xff]  ;;  %v64_v8 = vld [vmem:[%s371_s3 + $0x30] sm:$0x3]  ;;  %vm172_vm2 = vcmask 408576  }
   0x2   :  { %30 = vperm.xlu0 %258, %v22_v1   ;;  %25 = vperm.xlu1 %260, %v21_v2   ;;  %v20_v6 = vld [vmem:[%s370_s0] sm:$0x3]  ;;  %v60_v11 = vld [vmem:[%s371_s3 + $0x10] sm:$0xff]  ;;  %v63_v18 = vld [vmem:[%s371_s3 + $0x28] sm:$0xff] }
   0x3   :  { %262 = vset.pattern.permute.xlu2 %v269_v0  ;;  %v62_v7 = vld [vmem:[%s371_s3 + $0x20] sm:$0xff]  ;;  %v33_v9 = vperm.slane %v20_v6, 0  ;;  %v44_v10 = vperm.slane %v20_v6, 1  ;;  %v59_v19 = vld [vmem:[%s371_s3 + $0x8] sm:$0xff]  ;;  %v54_v24 = vld [vmem:[%s372_s2 + $0x18] sm:$0xff] }
   0x4   :  { %97 = vperm.xlu2 %262, %v64_v8   ;;  %v55_v25 = vld [vmem:[%s372_s2 + $0x20] sm:$0xff]  ;;  %v61_v27 = vld [vmem:[%s371_s3 + $0x18] sm:$0xff]  ;;  %v56_v28 = vld [vmem:[%s372_s2 + $0x28] sm:$0xff] }
   0x5   :  { %v51_v26 = vld [vmem:[%s372_s2] sm:$0xff]  ;;  %v52_v29 = vld [vmem:[%s372_s2 + $0x8] sm:$0xff]  ;;  %v57_v31 = vld [vmem:[%s372_s2 + $0x30] sm:$0x3] }
   0x6   :  { %v58_v30 = vld [vmem:[%s371_s3] sm:$0xff]  ;;  %v53_v32 = vld [vmem:[%s372_s2 + $0x10] sm:$0xff] }
   0x7   :  { %v171_v61 = vld [vmem:[%s373_s4] sm:$0xf] }
   0xa   :  { %259 = vset.pattern.permute.xlu0 %v270_v3  ;;  %261 = vset.pattern.permute.xlu1 %v270_v3 }
   0xb   :  { %41 = vperm.xlu0 %259, %v22_v1   ;;  %37 = vperm.xlu1 %261, %v21_v2  }
   0xc   :  { %92 = vperm.xlu2 %262, %v63_v18  }
  0x13   :  { %263 = vset.pattern.permute.xlu1 %v269_v0  ;;  %264 = vset.pattern.permute.xlu0 %v269_v0 }
  0x14   :  { %87 = vperm.xlu1 %263, %v62_v7   ;;  %77 = vperm.xlu0 %264, %v60_v11  }
  0x15   :  { %82 = vperm.xlu2 %262, %v61_v27  }
  0x1c   :  { %72 = vperm.xlu1 %263, %v59_v19  }
  0x1d   :  { %67 = vperm.xlu2 %262, %v58_v30  }
  0x5e   :  { %v98_v33 = vpop.permute.xlu2 %97 }
  0x66   :  { %v93_v36 = vpop.permute.xlu2 %92 }
  0x6f   :  { %v83_v39 = vpop.permute.xlu2 %82 }
  0x74   :  { %v31_v4 = vpop.permute.xlu0 %30  ;;  %v26_v5 = vpop.permute.xlu1 %25 }
  0x75   :  { %v35_v14 = vmul.f32 %v33_v9, %v31_v4  ;;  %v34_v15 = vmul.f32 %v33_v9, %v26_v5 }
  0x77   :  { %v68_v54 = vpop.permute.xlu2 %67 }
  0x7d   :  { %v42_v12 = vpop.permute.xlu0 %41  ;;  %v38_v13 = vpop.permute.xlu1 %37 }
  0x7e   :  { %v46_v16 = vmul.f32 %v44_v10, %v42_v12  ;;  %v45_v17 = vmul.f32 %v44_v10, %v38_v13 }
  0x80   :  { %v48_v20 = vadd.f32 %v46_v16, %v35_v14  ;;  %v47_v21 = vadd.f32 %v45_v17, %v34_v15 }
  0x82   :  { %v50_v22 = vmax.f32 %v48_v20, 0.0  ;;  %v49_v23 = vmax.f32 %v47_v21, 0.0 }
  0x84   :  { %242 = vmatpush.msk.msra.mxu0 %vm122_vm0, %v50_v22  ;;  %252 = vmatpush.msk.msra.mxu2 %vm122_vm0, %v50_v22 }
  0x85   :  { %253 = vmatpush.msk.msra.mxu3 %vm122_vm0, %v50_v22 }
  0x86   :  { %141 = vmatpush.msra.mxu0 %v49_v23  ;;  %254 = vmatpush.msra.mxu2 %v49_v23  ;;  %v88_v40 = vpop.permute.xlu1 %87  ;;  %v78_v44 = vpop.permute.xlu0 %77 }
  0x87   :  { %255 = vmatpush.msra.mxu3 %v49_v23  ;;  %246 = vmatmul.msk.f32.vlgmr.msra.gmra.mxu2 %vm100_vm1, %v54_v24 }
  0x88   :  { %247 = vmatmul.msk.f32.vlgmr.msra.gmra.mxu3 %vm100_vm1, %v55_v25  ;;  %243 = vmatmul.msk.f32.vlgmr.msra.gmra.mxu0 %vm100_vm1, %v51_v26 }
  0x8e   :  { %v73_v52 = vpop.permute.xlu1 %72 }
  0x90   :  { %248 = vmatmul.msk.f32.gmra.mxu3 %vm100_vm1, %v56_v28  ;;  %244 = vmatmul.msk.f32.gmra.mxu0 %vm100_vm1, %v52_v29 }
  0x98   :  { %249 = vmatmul.msk.f32.gmra.mxu3 %vm100_vm1, %v57_v31  ;;  %245 = vmatmul.msk.f32.gmra.mxu0 %vm100_vm1, %v53_v32 }
 0x105   :  { %v143_v35 = vpop.f32.mrf.mxu0 }
 0x106   :  { %v144_v58 = vadd.f32 %v143_v35, %v68_v54 }
 0x108   :  { %v164_v60 = vmax.f32 %v144_v58, 0.0 }
 0x10a   :  { %v152_v45 = vpop.f32.mrf.mxu2 }
 0x10b   :  { %v155_v34 = vpop.f32.mrf.mxu3  ;;  %v153_v49 = vadd.f32 %v152_v45, %v83_v39 }
 0x10c   :  { %v156_v47 = vadd.f32 %v155_v34, %v88_v40 }
 0x10d   :  { %v146_v38 = vpop.f32.mrf.mxu0  ;;  %v167_v55 = vmax.f32 %v153_v49, 0.0 }
 0x10e   :  { %v168_v53 = vmax.f32 %v156_v47, 0.0  ;;  %v147_v56 = vadd.f32 %v146_v38, %v73_v52 }
 0x110   :  { %v165_v59 = vmax.f32 %v147_v56, 0.0 }
 0x113   :  { %v158_v37 = vpop.f32.mrf.mxu3 }
 0x114   :  { %v159_v42 = vadd.f32 %v158_v37, %v93_v36 }
 0x115   :  { %v149_v46 = vpop.f32.mrf.mxu0 }
 0x116   :  { %v169_v50 = vmax.f32 %v159_v42, 0.0  ;;  %v150_v51 = vadd.f32 %v149_v46, %v78_v44 }
 0x118   :  { %v166_v57 = vmax.f32 %v150_v51, 0.0 }
 0x11b   :  { %v161_v41 = vpop.f32.mrf.mxu3 }
 0x11c   :  { %v162_v43 = vadd.f32 %v161_v41, %v98_v33 }
 0x11e   :  { %v170_v48 = vmax.f32 %v162_v43, 0.0 }
 0x120   :  { %250 = vmatpush.msk.msra.mxu1 %vm122_vm0, %v170_v48 }
 0x122   :  { %189 = vmatpush.msra.mxu1 %v169_v50 }
 0x124   :  { %190 = vmatpush.msra.mxu1 %v168_v53 }
 0x126   :  { %191 = vmatpush.msra.mxu1 %v167_v55 }
 0x128   :  { %192 = vmatpush.msra.mxu1 %v166_v57 }
 0x12a   :  { %193 = vmatpush.msra.mxu1 %v165_v59 }
 0x12c   :  { %194 = vmatpush.msra.mxu1 %v164_v60 }
 0x12d   :  { %251 = vmatmul.msk.f32.vlgmr.msra.gmra.mxu1 %vm172_vm2, %v171_v61 }
 0x1aa   :  { %v196_v62 = vpop.f32.mrf.mxu1 }
 0x1ab   :  { %v200_v63 = vrot.slane %v196_v62, 1 }
 0x1ad   :  { %v202_v0 = vmax.f32 %v196_v62, %v200_v63 }
 0x1af   :  { %v204_v1 = vrot.slane %v202_v0, 2 }
 0x1b1   :  { %v206_v2 = vmax.f32 %v202_v0, %v204_v1 }
 0x1b3   :  { %v207_v3 = vperm.slane %v206_v2, 0 }
 0x1b5   :  { %v208_v4 = vsub.f32 %v196_v62, %v207_v3 }
 0x1b7   :  { %v209_v5 = vmul.f32 1.442695, %v208_v4 }
 0x1b9   :  { %265 = vpow2.f32 %v209_v5 }
 0x1bf   :  { %v266_v6 = vpop.eup %265 }
 0x1c0   :  { %v212_v7 = vrot.slane %v266_v6, 1  ;;  %v215_v9 = vrot.slane %v266_v6, 2  ;;  %v218_v11 = vrot.slane %v266_v6, 3 }
 0x1c2   :  { %v214_v8 = vadd.f32 %v266_v6, %v212_v7 }
 0x1c4   :  { %v217_v10 = vadd.f32 %v215_v9, %v214_v8 }
 0x1c6   :  { %v220_v12 = vadd.f32 %v218_v11, %v217_v10 }
 0x1c8   :  { %267 = vrcp.f32 %v220_v12  ;;  %v232_v16 = vand.u32 2147483648, %v220_v12  ;;  %v230_v18 = vand.u32 2147483647, %v220_v12  ;;  %vm226_vm4 = vweird.f32 %v220_v12 }
 0x1ca   :  { %v233_v20 = vor.u32 1.1754944e-38, %v232_v16  ;;  %vm231_vm6 = vcmp.eq.f32.partialorder %v230_v18, 8.507059e+37 }
 0x1ce   :  { %v268_v13 = vpop.eup %267 }
 0x1cf   :  { %v222_v14 = vmul.f32 %v268_v13, %v220_v12  ;;  %vm227_vm3 = vweird.f32 %v268_v13 }
 0x1d0   :  { %vm228_vm5 = vmor %vm226_vm4, %vm227_vm3 }
 0x1d1   :  { %v223_v15 = vsub.f32 1.0, %v222_v14 }
 0x1d3   :  { %v224_v17 = vmul.f32 %v268_v13, %v223_v15 }
 0x1d5   :  { %v225_v19 = vadd.f32 %v268_v13, %v224_v17 }
 0x1d7   :  { %v229_v21 = vsel %vm228_vm5, %v268_v13, %v225_v19 }
 0x1d8   :  { %v234_v22 = vsel %vm231_vm6, %v233_v20, %v229_v21 }
 0x1d9   :  { %v235_v23 = vperm.slane %v234_v22, 0 }
 0x1db   :  { %v236_v24 = vmul.f32 %v266_v6, %v235_v23 }
 0x1dd   :  { %237 = vst [vmem:[%s374_s5] sm:$0xf] %v236_v24 }

</bundles_post_ra>
